<compile_context>
chip_gen: v6e
topology: v6e:2x2x1
jax: 0.10.0
libtpu: 0.0.40
codegen_flags: <defaults>
</compile_context>

<pallas_src>
import functools

import jax
import jax.numpy as jnp
from jax.experimental import pallas as pl
from jax.experimental.pallas import tpu as pltpu

# activation type constants (match the PyTorch ActivationFunction enum)
RELU, MISH, SELU, SWISH, RELU_2, NONE = 0, 1, 2, 3, 4, 5


def _apply_activation(h, activation_type):
    """Static (trace-time) activation selection, mirrors get_activation()."""
    if activation_type == RELU:
        return jnp.maximum(h, 0.0)
    if activation_type == MISH:
        return h * jnp.tanh(jax.nn.softplus(h))
    if activation_type == SELU:
        return jax.nn.selu(h)
    if activation_type == SWISH:
        return h * jax.nn.sigmoid(h)
    if activation_type == RELU_2:
        r = jnp.maximum(h, 0.0)
        return r * r
    if activation_type == NONE:
        return h
    raise ValueError(f"Unsupported activation type: {activation_type}")


def _ffn_kernel(x_ref, w1_ref, b1_ref, w2_ref, b2_ref, out_ref, acc_ref,
                *, activation_type, alpha, compute_dtype):
    d = pl.program_id(1)

    @pl.when(d == 0)
    def _():
        acc_ref[...] = jnp.zeros_like(acc_ref)

    x = x_ref[...]                                            # [TM, E]

    # dense1 (this D tile): bf16 MXU operands, f32 accumulation; bias + act in f32.
    h = jnp.dot(x.astype(compute_dtype), w1_ref[...].astype(compute_dtype),
                preferred_element_type=jnp.float32)
    h = h + b1_ref[...].astype(jnp.float32)
    h = _apply_activation(h, activation_type)                 # [TM, TD] f32

    # dense2 partial product, accumulated over D tiles in the f32 scratch.
    acc_ref[...] += jnp.dot(h.astype(compute_dtype), w2_ref[...].astype(compute_dtype),
                            preferred_element_type=jnp.float32)

    @pl.when(d == pl.num_programs(1) - 1)
    def _():
        y = acc_ref[...] + b2_ref[...].astype(jnp.float32)
        if alpha != 1.0:  # static Python branch, matches `if self.alpha != 1.0`
            y = y * alpha
        out_ref[...] = (y + x.astype(jnp.float32)).astype(out_ref.dtype)


def _round_up(v, m):
    return (v + m - 1) // m * m


def _choose_tiles(M, E, D, compute_itemsize, budget_bytes=24 * 1024 * 1024):
    """Pick (TM, TD) against an explicit VMEM working-set budget (v7x-safe)."""
    # D tile: stream weights over this axis; lane-aligned (128), 256-aligned
    # when large so the 256x256 MXUs on v6e/v7x stay fully fed.
    td = min(_round_up(D, 128), 2048)
    if td > 256:
        td = (td // 256) * 256
    # Bytes that scale with td: double-buffered w1/w2 tiles (+ bias tiles).
    w_bytes = 2 * (E * td + td * E) * compute_itemsize + 2 * (td + E) * 4
    # Bytes per TM row: x (2 bufs) + out (2 bufs) + accumulator, all f32 [*, E].
    per_row = 5 * E * 4
    tm = max((budget_bytes - w_bytes) // per_row, 8)
    tm = min(int(tm) // 8 * 8, 512)
    if tm >= 256:
        tm = (tm // 256) * 256
    tm = min(tm, _round_up(M, 8))
    return tm, td


def feed_forward(x, params, *, activation_type=RELU, alpha=1.0,
                 compute_dtype=jnp.bfloat16, tile_m=None, tile_d=None):
    """x: [..., E]. params: (w1 [E, D], b1 [1, D], w2 [D, E], b2 [1, E])."""
    w1, b1, w2, b2 = params
    E = x.shape[-1]
    D = w1.shape[1]
    orig_shape = x.shape

    # Fold all leading dims into M (free, contiguous reshape — no transpose).
    x2 = x.reshape(-1, E)
    M = x2.shape[0]

    cdt = jnp.dtype(compute_dtype)
    tm, td = _choose_tiles(M, E, D, cdt.itemsize)
    if tile_m is not None:
        tm = int(tile_m)
    if tile_d is not None:
        td = int(tile_d)

    Mp = _round_up(M, tm)
    Dp = _round_up(D, td)

    # Pad M (extra rows computed then sliced off) and D (padded w2 rows are
    # zero, so padded hidden units contribute exactly nothing).
    if Mp != M:
        x2 = jnp.pad(x2, ((0, Mp - M), (0, 0)))
    if Dp != D:
        w1 = jnp.pad(w1, ((0, 0), (0, Dp - D)))
        b1 = jnp.pad(b1, ((0, 0), (0, Dp - D)))
        w2 = jnp.pad(w2, ((0, Dp - D), (0, 0)))

    # Matmul operands live in HBM in the compute dtype (halves weight DMA for
    # bf16); biases stay f32 (added after the f32-accumulated dot).
    w1c = w1.astype(cdt)
    w2c = w2.astype(cdt)
    b1f = b1.astype(jnp.float32)
    b2f = b2.astype(jnp.float32)

    kernel = functools.partial(_ffn_kernel, activation_type=activation_type,
                               alpha=float(alpha), compute_dtype=cdt)

    grid = (Mp // tm, Dp // td)

    # Resident-VMEM estimate (default double-buffering on every BlockSpec is
    # accounted for, including the constant-index weight/bias blocks).
    est = (2 * 2 * tm * E * 4                       # x + out tiles, f32
           + 2 * (E * td + td * E) * cdt.itemsize   # w1 + w2 tiles
           + 2 * (td + E) * 4                       # bias tiles
           + tm * E * 4)                            # f32 accumulator scratch
    vmem_limit = int(min(max(2 * est, 32 * 1024 * 1024), 48 * 1024 * 1024))

    out = pl.pallas_call(
        kernel,
        out_shape=jax.ShapeDtypeStruct((Mp, E), x.dtype),
        grid_spec=pltpu.PrefetchScalarGridSpec(
            num_scalar_prefetch=0,
            grid=grid,
            in_specs=[
                pl.BlockSpec((tm, E), lambda i, d: (i, 0)),   # activations tile
                pl.BlockSpec((E, td), lambda i, d: (0, d)),   # dense1 weight tile
                pl.BlockSpec((1, td), lambda i, d: (0, d)),   # dense1 bias tile
                pl.BlockSpec((td, E), lambda i, d: (d, 0)),   # dense2 weight tile
                pl.BlockSpec((1, E), lambda i, d: (0, 0)),    # dense2 bias
            ],
            out_specs=pl.BlockSpec((tm, E), lambda i, d: (i, 0)),
            scratch_shapes=[pltpu.VMEM((tm, E), jnp.float32)],
        ),
        compiler_params=pltpu.CompilerParams(
            dimension_semantics=("parallel", "arbitrary"),
            vmem_limit_bytes=vmem_limit),
    )(x2, w1c, b1f, w2c, b2f)

    if Mp != M:
        out = out[:M]
    return out.reshape(orig_shape)


if __name__ == "__main__":
    key = jax.random.PRNGKey(0)

    def uniform_init(k, shape, fan_in):
        bound = 1.0 / (fan_in ** 0.5)
        return jax.random.uniform(k, shape, jnp.float32, -bound, bound)

    def make_params(k, E, D):
        ks = jax.random.split(k, 4)
        w1 = uniform_init(ks[0], (E, D), E)   # stored [in, out]
        b1 = uniform_init(ks[1], (1, D), E)
        w2 = uniform_init(ks[2], (D, E), D)
        b2 = uniform_init(ks[3], (1, E), D)
        return w1, b1, w2, b2

    def ref_forward(xr, params, act, alpha, cdt):
        """Pure-JAX reference with the same bf16-operand / f32-accum numerics."""
        w1, b1, w2, b2 = params
        Er = xr.shape[-1]
        x2r = xr.reshape(-1, Er)
        h = jnp.dot(x2r.astype(cdt), w1.astype(cdt),
                    preferred_element_type=jnp.float32) + b1
        h = _apply_activation(h, act)
        y = jnp.dot(h.astype(cdt), w2.astype(cdt),
                    preferred_element_type=jnp.float32) + b2
        if alpha != 1.0:
            y = y * alpha
        return (y + x2r).reshape(xr.shape)

    # ---- Test 1: module defaults (RELU, alpha=1.0); B=2, S=8, E=32, D=128 ----
    B, S, E, D = 2, 8, 32, 128
    k1, k2, key = jax.random.split(key, 3)
    params = make_params(k1, E, D)
    x = jax.random.normal(k2, (B, S, E), jnp.float32)

    out = jax.block_until_ready(
        feed_forward(x, params, activation_type=RELU, alpha=1.0))
    ref = ref_forward(x, params, RELU, 1.0, jnp.bfloat16)
    assert out.shape == x.shape
    assert jnp.allclose(out, ref, atol=2e-3, rtol=2e-3), "test1 mismatch"

    # ---- Test 2: exercises M/D tiling, padding, SWISH, alpha != 1.0 ----
    B, S, E, D = 3, 13, 32, 192          # M=39 -> padded to 48; D=192 -> padded to 256
    k1, k2, key = jax.random.split(key, 3)
    params = make_params(k1, E, D)
    x = jax.random.normal(k2, (B, S, E), jnp.float32)

    out = jax.block_until_ready(
        feed_forward(x, params, activation_type=SWISH, alpha=0.5,
                     tile_m=16, tile_d=128))
    ref = ref_forward(x, params, SWISH, 0.5, jnp.bfloat16)
    assert out.shape == x.shape
    assert jnp.allclose(out, ref, atol=2e-3, rtol=2e-3), "test2 mismatch"

    print("KERNEL_OK")
</pallas_src>

<mosaic_0001>
module attributes {stable_mosaic.version = 11 : i64} {
  func.func @_ffn_kernel(%arg0: i32, %arg1: i32, %arg2: memref<16x32xf32, #tpu.memory_space<vmem>>, %arg3: memref<32x128xbf16, #tpu.memory_space<vmem>>, %arg4: memref<1x128xf32, #tpu.memory_space<vmem>>, %arg5: memref<128x32xbf16, #tpu.memory_space<vmem>>, %arg6: memref<1x32xf32, #tpu.memory_space<vmem>>, %arg7: memref<16x32xf32, #tpu.memory_space<vmem>>, %arg8: memref<16x32xf32, #tpu.memory_space<vmem>>) attributes {dimension_semantics = [#tpu.dimension_semantics<parallel>, #tpu.dimension_semantics<arbitrary>], iteration_bounds = array<i64: 1, 1>, scalar_prefetch = 0 : i64, scratch_operands = 1 : i64, tpu.core_type = #tpu.core_type<tc>, window_params = [{transform_indices = @transform_0, window_bounds = array<i64: 16, 32>}, {transform_indices = @transform_1, window_bounds = array<i64: 32, 128>}, {transform_indices = @transform_2, window_bounds = array<i64: 1, 128>}, {transform_indices = @transform_3, window_bounds = array<i64: 128, 32>}, {pipeline_mode = #tpu.pipeline_mode<synchronous>, transform_indices = @transform_4, window_bounds = array<i64: 1, 32>}, {transform_indices = @transform_5, window_bounds = array<i64: 16, 32>}]} {
    %c0_i32 = arith.constant 0 : i32
    %0 = arith.cmpi eq, %arg1, %c0_i32 : i32
    %1 = arith.extui %0 : i1 to i32
    %c0_i32_0 = arith.constant 0 : i32
    %2 = arith.cmpi ne, %1, %c0_i32_0 : i32
    scf.if %2 {
      %cst_16 = arith.constant 0.000000e+00 : f32
      %21 = vector.broadcast %cst_16 : f32 to vector<16x32xf32>
      %c0_17 = arith.constant 0 : index
      %c0_18 = arith.constant 0 : index
      %22 = vector.load %arg8[%c0_17, %c0_18] : memref<16x32xf32, #tpu.memory_space<vmem>>, vector<16x32xf32>
      tpu.vector_store %arg8[%c0_17, %c0_18], %21 {strides = array<i32>} : memref<16x32xf32, #tpu.memory_space<vmem>>, vector<16x32xf32>,
    } else {
    }
    %c0 = arith.constant 0 : index
    %c0_1 = arith.constant 0 : index
    %3 = vector.load %arg2[%c0, %c0_1] : memref<16x32xf32, #tpu.memory_space<vmem>>, vector<16x32xf32>
    %4 = arith.truncf %3 : vector<16x32xf32> to vector<16x32xbf16>
    %c0_2 = arith.constant 0 : index
    %c0_3 = arith.constant 0 : index
    %5 = vector.load %arg3[%c0_2, %c0_3] : memref<32x128xbf16, #tpu.memory_space<vmem>>, vector<32x128xbf16>
    %cst = arith.constant dense<0.000000e+00> : vector<16x128xf32>
    %6 = tpu.matmul %4, %5, %cst {dimension_numbers = #tpu.dot_dimension_numbers<[1], [0], [0], [1], [0, 0, 1, 1], [], []>} : vector<16x32xbf16>, vector<32x128xbf16>, vector<16x128xf32> -> vector<16x128xf32>
    %c0_4 = arith.constant 0 : index
    %c0_5 = arith.constant 0 : index
    %7 = vector.load %arg4[%c0_4, %c0_5] : memref<1x128xf32, #tpu.memory_space<vmem>>, vector<1x128xf32>
    %8 = vector.broadcast %7 : vector<1x128xf32> to vector<16x128xf32>
    %9 = arith.addf %6, %8 : vector<16x128xf32>
    %cst_6 = arith.constant 0.000000e+00 : f32
    %10 = vector.broadcast %cst_6 : f32 to vector<16x128xf32>
    %11 = arith.maximumf %9, %10 : vector<16x128xf32>
    %c0_7 = arith.constant 0 : index
    %c0_8 = arith.constant 0 : index
    %12 = vector.load %arg8[%c0_7, %c0_8] : memref<16x32xf32, #tpu.memory_space<vmem>>, vector<16x32xf32>
    %13 = arith.truncf %11 : vector<16x128xf32> to vector<16x128xbf16>
    %c0_9 = arith.constant 0 : index
    %c0_10 = arith.constant 0 : index
    %14 = vector.load %arg5[%c0_9, %c0_10] : memref<128x32xbf16, #tpu.memory_space<vmem>>, vector<128x32xbf16>
    %cst_11 = arith.constant dense<0.000000e+00> : vector<16x32xf32>
    %15 = tpu.matmul %13, %14, %cst_11 {dimension_numbers = #tpu.dot_dimension_numbers<[1], [0], [0], [1], [0, 0, 1, 1], [], []>} : vector<16x128xbf16>, vector<128x32xbf16>, vector<16x32xf32> -> vector<16x32xf32>
    %16 = arith.addf %12, %15 : vector<16x32xf32>
    %c0_12 = arith.constant 0 : index
    %c0_13 = arith.constant 0 : index
    %17 = vector.load %arg8[%c0_12, %c0_13] : memref<16x32xf32, #tpu.memory_space<vmem>>, vector<16x32xf32>
    tpu.vector_store %arg8[%c0_12, %c0_13], %16 {strides = array<i32>} : memref<16x32xf32, #tpu.memory_space<vmem>>, vector<16x32xf32>,
    %c0_i32_14 = arith.constant 0 : i32
    %18 = arith.cmpi eq, %arg1, %c0_i32_14 : i32
    %19 = arith.extui %18 : i1 to i32
    %c0_i32_15 = arith.constant 0 : i32
    %20 = arith.cmpi ne, %19, %c0_i32_15 : i32
    scf.if %20 {
      %c0_16 = arith.constant 0 : index
      %c0_17 = arith.constant 0 : index
      %21 = vector.load %arg8[%c0_16, %c0_17] : memref<16x32xf32, #tpu.memory_space<vmem>>, vector<16x32xf32>
      %c0_18 = arith.constant 0 : index
      %c0_19 = arith.constant 0 : index
      %22 = vector.load %arg6[%c0_18, %c0_19] : memref<1x32xf32, #tpu.memory_space<vmem>>, vector<1x32xf32>
      %23 = vector.broadcast %22 : vector<1x32xf32> to vector<16x32xf32>
      %24 = arith.addf %21, %23 : vector<16x32xf32>
      %25 = arith.addf %24, %3 : vector<16x32xf32>
      %c0_20 = arith.constant 0 : index
      %c0_21 = arith.constant 0 : index
      %26 = vector.load %arg7[%c0_20, %c0_21] : memref<16x32xf32, #tpu.memory_space<vmem>>, vector<16x32xf32>
      tpu.vector_store %arg7[%c0_20, %c0_21], %25 {strides = array<i32>} : memref<16x32xf32, #tpu.memory_space<vmem>>, vector<16x32xf32>,
    } else {
    }
    return
  }
  func.func @transform_0(%arg0: i32, %arg1: i32) -> (i32, i32) {
    %c0_i32 = arith.constant 0 : i32
    %c0_i32_0 = arith.constant 0 : i32
    return %arg0, %c0_i32 : i32, i32
  }
  func.func @transform_1(%arg0: i32, %arg1: i32) -> (i32, i32) {
    %c0_i32 = arith.constant 0 : i32
    %c0_i32_0 = arith.constant 0 : i32
    return %c0_i32, %arg1 : i32, i32
  }
  func.func @transform_2(%arg0: i32, %arg1: i32) -> (i32, i32) {
    %c0_i32 = arith.constant 0 : i32
    %c0_i32_0 = arith.constant 0 : i32
    return %c0_i32, %arg1 : i32, i32
  }
  func.func @transform_3(%arg0: i32, %arg1: i32) -> (i32, i32) {
    %c0_i32 = arith.constant 0 : i32
    %c0_i32_0 = arith.constant 0 : i32
    return %arg1, %c0_i32 : i32, i32
  }
  func.func @transform_4(%arg0: i32, %arg1: i32) -> (i32, i32) {
    %c0_i32 = arith.constant 0 : i32
    %c0_i32_0 = arith.constant 0 : i32
    %c0_i32_1 = arith.constant 0 : i32
    return %c0_i32, %c0_i32_0 : i32, i32
  }
  func.func @transform_5(%arg0: i32, %arg1: i32) -> (i32, i32) {
    %c0_i32 = arith.constant 0 : i32
    %c0_i32_0 = arith.constant 0 : i32
    return %arg0, %c0_i32 : i32, i32
  }
}

</mosaic_0001>

<bundles_post_ra>
// kernel: tpu_custom_call.1
= control target key start
LH: loop header
LB: loop body
LE: loop exit
PB: predicated region body
PF: predicated region fallthrough
CT: control target
= control target key end

     0   :  { %v338_v1 = vmov 0.0   ;;  %vm339_vm0 = vmmov 0   ;;  %vm26_vm1 = vcmask 261120   ;;  %s429_s0 = inlined_call_operand.vmem [shape: f32[16,32], index: 0, kind: input, shape index: {}]   ;;  %s430_s1 = inlined_call_operand.vmem [shape: bf16[32,128], index: 1, kind: input, shape index: {}]   ;;  %s431_s2 = inlined_call_operand.vmem [shape: f32[1,128], index: 2, kind: input, shape index: {}]   ;;  %s432_s3 = inlined_call_operand.vmem [shape: bf16[128,32], index: 3, kind: input, shape index: {}]   ;;  %s433_s4 = inlined_call_operand.vmem [shape: f32[1,32], index: 4, kind: input, shape index: {}]   ;;  %s434_s5 = inlined_call_operand.hbm [shape: f32[16,32], index: 5, kind: output, shape index: {}]  }
   0x1   :  { %v306_v0 = vld [vmem:[%s430_s1 + $0x8] sm:$0xff]   ;;  %273 = vmatprep.subr.bf16.mxu0 %v338_v1  ;;  %v307_v2 = vld [vmem:[%s430_s1] sm:$0xff]   ;;  %281 = vmatprep.subr.bf16.mxu1 %v338_v1  ;;  %27 = vst.msk [vmem:[#allocation2] sm:$0xff] %vm26_vm1, %v338_v1  ;;  %28 = vst.msk [vmem:[#allocation2 + $0x8] sm:$0xff] %vm26_vm1, %v338_v1 }
   0x2   :  { %274 = vmatpush3.bf16.msra.mxu0 %v306_v0  ;;  %277 = vmatprep.mubr.msk.bf16.mxu0 %vm339_vm0, %v338_v1  ;;  %v29_v3 = vld [vmem:[%s429_s0] sm:$0xff]  ;;  %v385_v4 = vld [vmem:[%s429_s0 + $0x8] sm:$0xff]  ;;  %v308_v5 = vld [vmem:[%s432_s3 + $0x38] sm:$0xff]  }
   0x3   :  { %275 = vmatprep.subr.bf16.mxu0 %v338_v1  ;;  %297 = vmatprep.mubr.msk.bf16.mxu1 %vm339_vm0, %v338_v1  ;;  %v31_v6 = vpack.c.bf16 %v385_v4, %v29_v3  ;;  %v309_v7 = vld [vmem:[%s432_s3 + $0x30] sm:$0xff]   ;;  %v310_v8 = vld [vmem:[%s432_s3 + $0x28] sm:$0xff]  }
   0x4   :  { %282 = vmatpush3.bf16.msra.mxu1 %v308_v5 }
   0x5   :  { %283 = vmatprep.subr.bf16.mxu1 %v338_v1 }
   0x6   :  { %276 = vmatpush3.bf16.msra.mxu0 %v307_v2 }
   0x8   :  { %284 = vmatpush3.bf16.msra.mxu1 %v309_v7 }
   0x9   :  { %278 = vmatmul.mubr.msk.bf16.vlgmr.msra.gmra.mxu0 %vm26_vm1, %v31_v6  ;;  %285 = vmatprep.subr.bf16.mxu1 %v338_v1 }
   0xa   :  { %10 = vsyncpa [#allocation4], 0  ;;  %v311_v9 = vld [vmem:[%s432_s3 + $0x20] sm:$0xff]   ;;  %v312_v10 = vld [vmem:[%s432_s3 + $0x18] sm:$0xff]   ;;  %s340_s17 = smov [#allocation3]  }
   0xb   :  { %v313_v11 = vld [vmem:[%s432_s3 + $0x10] sm:$0xff]   ;;  %v314_v12 = vld [vmem:[%s432_s3 + $0x8] sm:$0xff]   ;;  %v315_v13 = vld [vmem:[%s432_s3] sm:$0xff]   ;;  %s237_s18 = sshll.u32 %s340_s17, 4  ;;  %s238_s18 = int_to_ptr.vmem [resolvable:$true] %s237_s18 }
   0xc   :  { %286 = vmatpush3.bf16.msra.mxu1 %v310_v8  ;;  %v248_v14 = vld [vmem:[%s431_s2] ss:$0 sm:$0xff]  ;;  %v103_v28 = vld [vmem:[#allocation2 + $0x8] sm:$0xff]  ;;  %s316_s19 = scalar_lea.vmem %s238_s18, 256  ;;  %p321_p1 = scmp.lt.s32.totalorder %s238_s18, %s238_s18 }
   0xd   :  { %287 = vmatprep.subr.bf16.mxu1 %v338_v1  ;;  %v102_v24 = vld [vmem:[#allocation2] sm:$0xff]  ;;  %p317_p0 = scmp.ne.s32.totalorder %s238_s18, %s316_s19  ;;  %p322_p2 = scmp.lt.s32.totalorder %s316_s19, %s316_s19 }
   0xe   :  { %v260_v32 = vld [vmem:[%s433_s4] ss:$0 sm:$0xff] }
   0xf   :  { %p323_p3 = por %p322_p2, %p321_p1 }
  0x10   :  { %288 = vmatpush3.bf16.msra.mxu1 %v311_v9 }
  0x11   :  { %289 = vmatprep.subr.bf16.mxu1 %v338_v1  ;;  %p324_p4 = pnand %p323_p3, %p317_p0 }
  0x14   :  { %290 = vmatpush3.bf16.msra.mxu1 %v312_v10 }
  0x15   :  { %291 = vmatprep.subr.bf16.mxu1 %v338_v1 }
  0x18   :  { %292 = vmatpush3.bf16.msra.mxu1 %v313_v11 }
  0x19   :  { %293 = vmatprep.subr.bf16.mxu1 %v338_v1 }
  0x1c   :  { %294 = vmatpush3.bf16.msra.mxu1 %v314_v12 }
  0x1d   :  { %295 = vmatprep.subr.bf16.mxu1 %v338_v1 }
  0x20   :  { %296 = vmatpush3.bf16.msra.mxu1 %v315_v13 }
  0xc9   :  { %v93_v15 = vpop.f32.mrf.mxu0 }
  0xca   :  { %v94_v17 = vadd.f32 %v248_v14, %v93_v15 }
  0xcb   :  { %v279_v16 = vpop.f32.mrf.mxu0 }
  0xcc   :  { %v100_v21 = vmax.f32 %v94_v17, 0.0 }
  0xcd   :  { %v96_v18 = vpop.f32.mrf.mxu0 }
  0xce   :  { %v97_v19 = vadd.f32 %v248_v14, %v96_v18 }
  0xcf   :  { %v280_v20 = vpop.f32.mrf.mxu0 }
  0xd0   :  { %v101_v22 = vmax.f32 %v97_v19, 0.0 }
  0xd2   :  { %v104_v23 = vpack.c.bf16 %v101_v22, %v100_v21 }
  0xd4   :  { %298 = vmatmul.mubr.bf16.vlgmr.msra.gmra.mxu1 %v104_v23 }
 0x194   :  { %v203_v25 = vpop.f32.mrf.mxu1 }
 0x195   :  { %v210_v26 = vadd.f32 %v203_v25, %v102_v24 }
 0x196   :  { %v299_v27 = vpop.f32.mrf.mxu1 }
 0x197   :  { %212 = vst.msk [vmem:[#allocation2] sm:$0xff] %vm26_vm1, %v210_v26 }
 0x198   :  { %v206_v29 = vpop.f32.mrf.mxu1 }
 0x199   :  { %v211_v30 = vadd.f32 %v206_v29, %v103_v28 }
 0x19a   :  { %v300_v31 = vpop.f32.mrf.mxu1 }
 0x19b   :  { %213 = vst.msk [vmem:[#allocation2 + $0x8] sm:$0xff] %vm26_vm1, %v211_v30 }
 0x19e   :  { %v217_v33 = vld [vmem:[#allocation2] sm:$0xff] }
 0x19f   :  { %v226_v34 = vadd.f32 %v260_v32, %v217_v33 }
 0x1a1   :  { %v228_v35 = vadd.f32 %v226_v34, %v29_v3 }
 0x1a2   :  { %v218_v36 = vld [vmem:[#allocation2 + $0x8] sm:$0xff] }
 0x1a3   :  { %v227_v37 = vadd.f32 %v260_v32, %v218_v36  ;;  %230 = vst.msk [vmem:[#allocation3] sm:$0xff] %vm26_vm1, %v228_v35 }
 0x1a5   :  { %v229_v38 = vadd.f32 %v227_v37, %v385_v4 }
 0x1a7   :  { %231 = vst.msk [vmem:[#allocation3 + $0x8] sm:$0xff] %vm26_vm1, %v229_v38 }
 0x1a8   :  { %327 = shalt.err (!%p324_p4)
}
 0x1a9   :  { %s341_s4 = smov 128   ;;  %s342_s20 = smov 8  }
 0x1aa   :  { %243 = dma.vmem_to_hbm [thread:$0]  %s238_s18, 256, %s434_s5, [#allocation4], %s341_s4, %s341_s4, %s342_s20  }
 0x1ab   :  { %336 = dma.done.wait [#allocation4], 256  }
 0x1ac   :  { %337 = vsyncadd [#allocation4], 4294967040 }
 0x1ad   :  { %247 = vsyncpa [#allocation4], 1 }

</bundles_post_ra>
